<compile_context>
chip_gen: v7x
topology: tpu7x:2x2x1
jax: 0.10.0
libtpu: 0.0.40
codegen_flags: <defaults>
</compile_context>

<pallas_src>
import jax
import jax.numpy as jnp
from jax.experimental import pallas as pl
from jax.experimental.pallas import tpu as pltpu

DEFAULT_ALPHA = 1.0
DEFAULT_SQUEEZE_RATIO = 0.25


def _round_up(x, m):
    return (x + m - 1) // m * m


def _round_down(x, m):
    return x // m * m


def _vmem_capacity_bytes():
    """Physical per-TensorCore VMEM (v5e/v6e: 128 MiB, v7x: 64 MiB)."""
    try:
        return int(pltpu.get_tpu_info().vmem_capacity_bytes)
    except Exception:
        return 64 * 2 ** 20  # conservative (v7x-sized) fallback


# --------------------------------------------------------------------------- #
# One-time parameter preparation (hoisted out of the per-call hot path)
# --------------------------------------------------------------------------- #
def prepare_rose_weights(params, *, apply_se=True, apply_rotation=True):
    """expm + transpose + zero-pad to lane-dense shapes + bf16 cast, done once."""
    W1 = params["w1"]; b1 = params["b1"]
    W2 = params["w2"]; b2 = params["b2"]
    H, D = W1.shape
    Dp = _round_up(D, 128)   # feature dim on lanes: multiple of 128
    Hp = _round_up(H, 128)   # SE hidden dim on lanes: multiple of 128

    prep = {"D": D, "H": H, "Dp": Dp, "Hp": Hp,
            "apply_se": bool(apply_se), "apply_rotation": bool(apply_rotation)}

    if apply_rotation:
        P = params["ol_param"]
        A = (P - P.T).astype(jnp.float32)
        # expm(A) is orthogonal; expm(-A) == expm(A).T, so the inverse rotation
        # F.linear(x, expm(-A)) == x @ expm(A).
        W_orth = jax.scipy.linalg.expm(A)                      # (D, D) f32
        prep["wrt"] = jnp.zeros((Dp, Dp), jnp.bfloat16).at[:D, :D].set(
            W_orth.T.astype(jnp.bfloat16))                     # for x @ W_orth.T
        prep["wr"] = jnp.zeros((Dp, Dp), jnp.bfloat16).at[:D, :D].set(
            W_orth.astype(jnp.bfloat16))                       # for inverse rotation

    if apply_se:
        prep["w1t"] = jnp.zeros((Dp, Hp), jnp.bfloat16).at[:D, :H].set(
            W1.T.astype(jnp.bfloat16))
        prep["b1"] = jnp.zeros((1, Hp), jnp.float32).at[0, :H].set(
            b1.astype(jnp.float32))
        prep["w2t"] = jnp.zeros((Hp, Dp), jnp.bfloat16).at[:H, :D].set(
            W2.T.astype(jnp.bfloat16))
        prep["b2"] = jnp.zeros((1, Dp), jnp.float32).at[0, :D].set(
            b2.astype(jnp.float32))

    return prep


# --------------------------------------------------------------------------- #
# Fused Rose kernel (rotation + SE + inverse rotation in one pass)
# --------------------------------------------------------------------------- #
def _make_rose_kernel(alpha, apply_se, apply_rotation):
    """Trace-time specialized kernel: disabled branches emit no ops at all."""
    alpha = float(alpha)

    def kernel(*refs):
        i = 0
        x_ref = refs[i]; i += 1
        if apply_rotation:
            wrt_ref, wr_ref = refs[i], refs[i + 1]; i += 2
        if apply_se:
            w1t_ref, b1_ref, w2t_ref, b2_ref = refs[i:i + 4]; i += 4
        o_ref = refs[i]

        x = x_ref[...]

        if apply_rotation:
            # x streamed as bf16 already; bf16 x bf16 -> f32 accumulate on the MXU.
            xr = jnp.dot(x, wrt_ref[...], preferred_element_type=jnp.float32)
        else:
            xr = x.astype(jnp.float32)

        if apply_se:
            # Squeeze-excitation MLP: ReLU(xr @ W1.T + b1) @ W2.T + b2
            h = jnp.dot(xr.astype(jnp.bfloat16), w1t_ref[...],
                        preferred_element_type=jnp.float32) + b1_ref[...]
            h = jnp.maximum(h, 0.0)
            logits = jnp.dot(h.astype(jnp.bfloat16), w2t_ref[...],
                             preferred_element_type=jnp.float32) + b2_ref[...]
            # sigmoid = 1 / (1 + exp(-logits)); exp and approx-reciprocal both run
            # on the EUP slot, keeping the divide off the VALU.
            sigma = pl.reciprocal(1.0 + jnp.exp(-logits), approx=True)
            if alpha != 1.0:
                # At the default alpha == 1.0 this blend is skipped entirely.
                sigma = (1.0 - alpha) + alpha * sigma
            xs = xr * sigma
        else:
            xs = xr

        if apply_rotation:
            out = jnp.dot(xs.astype(jnp.bfloat16), wr_ref[...],
                          preferred_element_type=jnp.float32)
        else:
            out = xs

        o_ref[...] = out.astype(o_ref.dtype)

    return kernel


def _fused_rose_call(xp, prep, *, alpha, apply_se, apply_rotation, TB, out_dtype,
                     vmem_limit, single_buffer_weights):
    """Single pallas_call over a batch-tiled grid with VMEM-resident weights."""
    Bp, Dp = xp.shape
    Hp = prep["Hp"]
    grid = (Bp // TB,)

    def resident(shape):
        if single_buffer_weights:
            # Constant index_map -> DMA'd once; one buffer is enough.
            return pl.BlockSpec(shape, lambda i: (0, 0),
                                pipeline_mode=pl.Buffered(1))
        return pl.BlockSpec(shape, lambda i: (0, 0))

    inputs = [xp]
    in_specs = [pl.BlockSpec((TB, Dp), lambda i: (i, 0))]

    flops = 0
    transcendentals = 0
    weight_bytes = 0

    if apply_rotation:
        inputs += [prep["wrt"], prep["wr"]]
        in_specs += [resident((Dp, Dp)), resident((Dp, Dp))]
        flops += 2 * (2 * Bp * Dp * Dp)
        weight_bytes += 2 * Dp * Dp * 2

    if apply_se:
        inputs += [prep["w1t"], prep["b1"], prep["w2t"], prep["b2"]]
        in_specs += [resident((Dp, Hp)), resident((1, Hp)),
                     resident((Hp, Dp)), resident((1, Dp))]
        flops += 2 * (2 * Bp * Dp * Hp)
        transcendentals += Bp * Dp
        weight_bytes += 2 * Dp * Hp * 2 + (Hp + Dp) * 4

    in_item = jnp.dtype(xp.dtype).itemsize
    out_item = jnp.dtype(out_dtype).itemsize
    cost = pl.CostEstimate(
        flops=flops,
        transcendentals=transcendentals,
        bytes_accessed=weight_bytes + Bp * Dp * (in_item + out_item))

    kernel = _make_rose_kernel(alpha, apply_se, apply_rotation)

    return pl.pallas_call(
        kernel,
        out_shape=jax.ShapeDtypeStruct((Bp, Dp), out_dtype),
        grid=grid,
        in_specs=in_specs,
        out_specs=pl.BlockSpec((TB, Dp), lambda i: (i, 0)),
        compiler_params=pltpu.CompilerParams(
            dimension_semantics=("parallel",),   # v7x megacore sharding; no-op v5e/v6e
            vmem_limit_bytes=int(vmem_limit)),
        cost_estimate=cost,
    )(*inputs)


def _fused_rose_call_safe(*args, **kwargs):
    """Try single-buffered resident weights; fall back to default double-buffering
    if this Pallas version rejects pl.Buffered(1) (costs VMEM only)."""
    try:
        return _fused_rose_call(*args, **kwargs, single_buffer_weights=True)
    except Exception:
        return _fused_rose_call(*args, **kwargs, single_buffer_weights=False)


# --------------------------------------------------------------------------- #
# Weight-streaming fallback (large D on v7x: Dp x Dp weights don't fit VMEM)
# --------------------------------------------------------------------------- #
def _matmul_kernel(a_ref, b_ref, o_ref, acc_ref):
    @pl.when(pl.program_id(2) == 0)
    def _():
        acc_ref[...] = jnp.zeros_like(acc_ref)

    acc_ref[...] += jnp.dot(a_ref[...], b_ref[...],
                            preferred_element_type=jnp.float32)

    @pl.when(pl.program_id(2) == pl.num_programs(2) - 1)
    def _():
        o_ref[...] = acc_ref[...].astype(o_ref.dtype)


def _largest_divisor_tile(n, candidates=(512, 256, 128)):
    for c in candidates:
        if n % c == 0:
            return c
    return n


def _tiled_matmul(a, b, out_dtype, tm, vmem_limit):
    M, K = a.shape
    _, N = b.shape
    tn = _largest_divisor_tile(N)
    tk = _largest_divisor_tile(K)
    return pl.pallas_call(
        _matmul_kernel,
        out_shape=jax.ShapeDtypeStruct((M, N), out_dtype),
        grid=(M // tm, N // tn, K // tk),
        in_specs=[pl.BlockSpec((tm, tk), lambda i, j, k: (i, k)),
                  pl.BlockSpec((tk, tn), lambda i, j, k: (k, j))],
        out_specs=pl.BlockSpec((tm, tn), lambda i, j, k: (i, j)),
        scratch_shapes=[pltpu.VMEM((tm, tn), jnp.float32)],
        compiler_params=pltpu.CompilerParams(
            dimension_semantics=("parallel", "parallel", "arbitrary"),
            vmem_limit_bytes=int(vmem_limit)),
    )(a, b)


# --------------------------------------------------------------------------- #
# Forward wrapper
# --------------------------------------------------------------------------- #
def rose_forward(x, params=None, *, prepared=None, alpha=DEFAULT_ALPHA,
                 apply_se=True, apply_rotation=True, batch_tile=None,
                 force_weight_streaming=False):
    """Rose forward.  `prepared` (from prepare_rose_weights) should be built once
    and reused across calls; if omitted it is derived from `params` here."""
    assert x.ndim == 2, "Input shape must be (B, D)"
    B, D = x.shape

    if prepared is None:
        assert params is not None, "need either raw params or prepared weights"
        prepared = prepare_rose_weights(params, apply_se=apply_se,
                                        apply_rotation=apply_rotation)
    # Trace-time flags follow whatever the prepared weights were built for.
    apply_se = prepared["apply_se"]
    apply_rotation = prepared["apply_rotation"]
    assert prepared["D"] == D, "prepared weights were built for a different D"
    Dp, Hp = prepared["Dp"], prepared["Hp"]

    # ---- shape-aware batch tile ----------------------------------------------
    B8 = _round_up(B, 8)
    if batch_tile is None:
        if Dp <= 512:
            tb_target = 1024   # tiny weights -> amortize ~0.35us/grid-step overhead
        elif Dp <= 2048:
            tb_target = 512
        elif Dp <= 4096:
            tb_target = 256
        else:
            tb_target = 128    # keep f32 intermediates (~5*TB*Dp*4B) in VMEM budget
    else:
        tb_target = int(batch_tile)
    TB = min(_round_up(tb_target, 8), B8)
    if B8 >= 16:
        # Ensure >= 2 grid steps so the "parallel" axis can shard across both
        # v7x TensorCores (each TC keeps its own copy of the resident weights).
        TB = min(TB, max(_round_down(B8 // 2, 8), 8))
    TB = max(TB, 8)
    Bp = _round_up(B8, TB)

    # ---- x layout: pad / cast only when needed --------------------------------
    # Stream x as bf16 whenever the rotation is applied (the kernel feeds the MXU
    # bf16 anyway) -> half the per-step input DMA.  Identity/no-rotation path
    # keeps the original dtype so x itself is not quantized.
    stream_dtype = jnp.bfloat16 if apply_rotation else x.dtype
    needs_pad = (Bp != B) or (Dp != D) or (jnp.dtype(x.dtype) != jnp.dtype(stream_dtype))
    if needs_pad:
        xp = jnp.zeros((Bp, Dp), stream_dtype).at[:B, :D].set(x.astype(stream_dtype))
    else:
        xp = x

    # ---- generation-aware VMEM budget -----------------------------------------
    vmem_cap = _vmem_capacity_bytes()
    budget = int(0.85 * vmem_cap)

    weight_bytes = 0
    if apply_rotation:
        weight_bytes += 2 * Dp * Dp * 2                       # wrt + wr (bf16)
    if apply_se:
        weight_bytes += 2 * Dp * Hp * 2 + (Hp + Dp) * 4       # w1t + w2t + biases
    in_tile = TB * Dp * jnp.dtype(stream_dtype).itemsize
    out_tile = TB * Dp * jnp.dtype(x.dtype).itemsize
    interm = 5 * TB * max(Dp, Hp) * 4                         # xr/h/logits/sigma/xs f32
    fused_need = weight_bytes + 2 * (in_tile + out_tile) + interm

    use_fused = (not force_weight_streaming) and (fused_need <= int(0.7 * vmem_cap))

    if use_fused:
        vmem_limit = min(budget, max(fused_need + fused_need // 2, 16 * 2 ** 20))
        out_p = _fused_rose_call_safe(
            xp, prepared, alpha=alpha, apply_se=apply_se,
            apply_rotation=apply_rotation, TB=TB, out_dtype=x.dtype,
            vmem_limit=vmem_limit)
    else:
        # Fallback for large D (v7x 64 MiB VMEM): stream the Dp x Dp rotation
        # weights through tiled matmuls; keep only the 4x smaller SE weights
        # resident in the fused SE stage.
        mm_vmem = min(budget, 32 * 2 ** 20)
        if apply_rotation:
            xr = _tiled_matmul(xp, prepared["wrt"], jnp.bfloat16, TB, mm_vmem)
        else:
            xr = xp
        if apply_se:
            se_need = (2 * Dp * Hp * 2 + (Hp + Dp) * 4) + 4 * (TB * Dp * 2) + interm
            # TODO(synk): for extreme D where even the SE weights exceed VMEM, the
            # SE matmuls would need their own K/N tiling; not implemented.
            xs = _fused_rose_call_safe(
                xr, prepared, alpha=alpha, apply_se=True, apply_rotation=False,
                TB=TB, out_dtype=jnp.bfloat16 if apply_rotation else x.dtype,
                vmem_limit=min(budget, max(se_need + se_need // 2, 16 * 2 ** 20)))
        else:
            xs = xr
        if apply_rotation:
            out_p = _tiled_matmul(xs, prepared["wr"], x.dtype, TB, mm_vmem)
        else:
            out_p = xs

    if (Bp != B) or (Dp != D):
        out_p = out_p[:B, :D]
    return out_p


# --------------------------------------------------------------------------- #
# Params + pure-JAX reference (mirrors the PyTorch forward)
# --------------------------------------------------------------------------- #
def make_params(key, features, squeeze_ratio=DEFAULT_SQUEEZE_RATIO):
    hidden = int(features * squeeze_ratio)
    k1, k2, k3, k4, k5 = jax.random.split(key, 5)
    ol_param = jax.random.uniform(k1, (features, features), dtype=jnp.float32)
    lim1 = 1.0 / jnp.sqrt(features)
    lim2 = 1.0 / jnp.sqrt(hidden)
    w1 = jax.random.uniform(k2, (hidden, features), minval=-lim1, maxval=lim1)
    b1 = jax.random.uniform(k3, (hidden,), minval=-lim1, maxval=lim1)
    w2 = jax.random.uniform(k4, (features, hidden), minval=-lim2, maxval=lim2)
    b2 = jax.random.uniform(k5, (features,), minval=-lim2, maxval=lim2)
    return {"ol_param": ol_param, "w1": w1, "b1": b1, "w2": w2, "b2": b2}


def rose_reference(x, params, alpha=DEFAULT_ALPHA, apply_se=True, apply_rotation=True):
    A = params["ol_param"] - params["ol_param"].T
    out = x
    if apply_rotation:
        W = jax.scipy.linalg.expm(A)
        out = out @ W.T
    if apply_se:
        h = jnp.maximum(out @ params["w1"].T + params["b1"], 0.0)
        logits = h @ params["w2"].T + params["b2"]
        sigma = jax.nn.sigmoid(logits)
        sigma = 1.0 - alpha + alpha * sigma
        out = out * sigma
    if apply_rotation:
        Winv = jax.scipy.linalg.expm(-A)
        out = out @ Winv.T
    return out


if __name__ == "__main__":
    key = jax.random.PRNGKey(0)
    kx, kp = jax.random.split(key)

    B, D = 8, 32  # features=32 -> squeeze hidden = 8
    x = jax.random.normal(kx, (B, D), dtype=jnp.float32)
    params = make_params(kp, D)

    # One-time weight prep (expm, transpose, pad, bf16 cast) hoisted out of the
    # per-forward hot path.
    prep_full = prepare_rose_weights(params, apply_se=True, apply_rotation=True)
    prep_nose = prepare_rose_weights(params, apply_se=False, apply_rotation=True)
    prep_norot = prepare_rose_weights(params, apply_se=True, apply_rotation=False)

    # Full path: rotate -> SE -> inverse rotate (fused, resident weights)
    out = jax.block_until_ready(rose_forward(x, prepared=prep_full))
    ref = rose_reference(x, params)
    assert out.shape == (B, D)
    # bf16 matmul operands -> small deviations vs the f32 reference
    assert jnp.allclose(out, ref, atol=7.5e-2, rtol=7.5e-2), "mismatch vs reference"

    # Specialized paths (trace-time branches drop the unused matmuls entirely)
    out_nose = jax.block_until_ready(rose_forward(x, prepared=prep_nose))
    ref_nose = rose_reference(x, params, apply_se=False)
    assert jnp.allclose(out_nose, ref_nose, atol=7.5e-2, rtol=7.5e-2), "mismatch (no SE)"

    out_norot = jax.block_until_ready(rose_forward(x, prepared=prep_norot))
    ref_norot = rose_reference(x, params, apply_rotation=False)
    assert jnp.allclose(out_norot, ref_norot, atol=7.5e-2, rtol=7.5e-2), "mismatch (no rotation)"

    # Exercise the weight-streaming fallback path (what very large D / v7x takes)
    out_stream = jax.block_until_ready(
        rose_forward(x, prepared=prep_full, force_weight_streaming=True))
    assert jnp.allclose(out_stream, ref, atol=7.5e-2, rtol=7.5e-2), "mismatch (streamed)"

    print("KERNEL_OK")
</pallas_src>

<mosaic_0001>
module attributes {stable_mosaic.version = 11 : i64} {
  func.func @kernel(%arg0: i32, %arg1: memref<8x128xbf16, #tpu.memory_space<vmem>>, %arg2: memref<128x128xbf16, #tpu.memory_space<vmem>>, %arg3: memref<128x128xbf16, #tpu.memory_space<vmem>>, %arg4: memref<128x128xbf16, #tpu.memory_space<vmem>>, %arg5: memref<1x128xf32, #tpu.memory_space<vmem>>, %arg6: memref<128x128xbf16, #tpu.memory_space<vmem>>, %arg7: memref<1x128xf32, #tpu.memory_space<vmem>>, %arg8: memref<8x128xf32, #tpu.memory_space<vmem>>) attributes {dimension_semantics = [#tpu.dimension_semantics<parallel>], iteration_bounds = array<i64: 1>, scalar_prefetch = 0 : i64, scratch_operands = 0 : i64, tpu.core_type = #tpu.core_type<tc>, window_params = [{transform_indices = @transform_0, window_bounds = array<i64: 8, 128>}, {pipeline_mode = #tpu.pipeline_mode<synchronous>, transform_indices = @transform_1, window_bounds = array<i64: 128, 128>}, {pipeline_mode = #tpu.pipeline_mode<synchronous>, transform_indices = @transform_2, window_bounds = array<i64: 128, 128>}, {pipeline_mode = #tpu.pipeline_mode<synchronous>, transform_indices = @transform_3, window_bounds = array<i64: 128, 128>}, {pipeline_mode = #tpu.pipeline_mode<synchronous>, transform_indices = @transform_4, window_bounds = array<i64: 1, 128>}, {pipeline_mode = #tpu.pipeline_mode<synchronous>, transform_indices = @transform_5, window_bounds = array<i64: 128, 128>}, {pipeline_mode = #tpu.pipeline_mode<synchronous>, transform_indices = @transform_6, window_bounds = array<i64: 1, 128>}, {transform_indices = @transform_7, window_bounds = array<i64: 8, 128>}]} {
    %c0 = arith.constant 0 : index
    %c0_0 = arith.constant 0 : index
    %0 = vector.load %arg1[%c0, %c0_0] : memref<8x128xbf16, #tpu.memory_space<vmem>>, vector<8x128xbf16>
    %c0_1 = arith.constant 0 : index
    %c0_2 = arith.constant 0 : index
    %1 = vector.load %arg2[%c0_1, %c0_2] : memref<128x128xbf16, #tpu.memory_space<vmem>>, vector<128x128xbf16>
    %cst = arith.constant dense<0.000000e+00> : vector<8x128xf32>
    %2 = tpu.matmul %0, %1, %cst {dimension_numbers = #tpu.dot_dimension_numbers<[1], [0], [0], [1], [0, 0, 1, 1], [], []>} : vector<8x128xbf16>, vector<128x128xbf16>, vector<8x128xf32> -> vector<8x128xf32>
    %3 = arith.truncf %2 : vector<8x128xf32> to vector<8x128xbf16>
    %c0_3 = arith.constant 0 : index
    %c0_4 = arith.constant 0 : index
    %4 = vector.load %arg4[%c0_3, %c0_4] : memref<128x128xbf16, #tpu.memory_space<vmem>>, vector<128x128xbf16>
    %cst_5 = arith.constant dense<0.000000e+00> : vector<8x128xf32>
    %5 = tpu.matmul %3, %4, %cst_5 {dimension_numbers = #tpu.dot_dimension_numbers<[1], [0], [0], [1], [0, 0, 1, 1], [], []>} : vector<8x128xbf16>, vector<128x128xbf16>, vector<8x128xf32> -> vector<8x128xf32>
    %c0_6 = arith.constant 0 : index
    %c0_7 = arith.constant 0 : index
    %6 = vector.load %arg5[%c0_6, %c0_7] : memref<1x128xf32, #tpu.memory_space<vmem>>, vector<1x128xf32>
    %7 = vector.broadcast %6 : vector<1x128xf32> to vector<8x128xf32>
    %8 = arith.addf %5, %7 : vector<8x128xf32>
    %cst_8 = arith.constant 0.000000e+00 : f32
    %9 = vector.broadcast %cst_8 : f32 to vector<8x128xf32>
    %10 = arith.maximumf %8, %9 : vector<8x128xf32>
    %11 = arith.truncf %10 : vector<8x128xf32> to vector<8x128xbf16>
    %c0_9 = arith.constant 0 : index
    %c0_10 = arith.constant 0 : index
    %12 = vector.load %arg6[%c0_9, %c0_10] : memref<128x128xbf16, #tpu.memory_space<vmem>>, vector<128x128xbf16>
    %cst_11 = arith.constant dense<0.000000e+00> : vector<8x128xf32>
    %13 = tpu.matmul %11, %12, %cst_11 {dimension_numbers = #tpu.dot_dimension_numbers<[1], [0], [0], [1], [0, 0, 1, 1], [], []>} : vector<8x128xbf16>, vector<128x128xbf16>, vector<8x128xf32> -> vector<8x128xf32>
    %c0_12 = arith.constant 0 : index
    %c0_13 = arith.constant 0 : index
    %14 = vector.load %arg7[%c0_12, %c0_13] : memref<1x128xf32, #tpu.memory_space<vmem>>, vector<1x128xf32>
    %15 = vector.broadcast %14 : vector<1x128xf32> to vector<8x128xf32>
    %16 = arith.addf %13, %15 : vector<8x128xf32>
    %cst_14 = arith.constant 0.000000e+00 : f32
    %17 = vector.broadcast %cst_14 : f32 to vector<8x128xf32>
    %18 = arith.subf %17, %16 : vector<8x128xf32>
    %19 = math.exp %18 : vector<8x128xf32>
    %cst_15 = arith.constant 1.000000e+00 : f32
    %20 = vector.broadcast %cst_15 : f32 to vector<8x128xf32>
    %21 = arith.addf %20, %19 : vector<8x128xf32>
    %22 = tpu.reciprocal %21 {approx = true} : vector<8x128xf32> -> vector<8x128xf32>
    %23 = arith.mulf %2, %22 : vector<8x128xf32>
    %24 = arith.truncf %23 : vector<8x128xf32> to vector<8x128xbf16>
    %c0_16 = arith.constant 0 : index
    %c0_17 = arith.constant 0 : index
    %25 = vector.load %arg3[%c0_16, %c0_17] : memref<128x128xbf16, #tpu.memory_space<vmem>>, vector<128x128xbf16>
    %cst_18 = arith.constant dense<0.000000e+00> : vector<8x128xf32>
    %26 = tpu.matmul %24, %25, %cst_18 {dimension_numbers = #tpu.dot_dimension_numbers<[1], [0], [0], [1], [0, 0, 1, 1], [], []>} : vector<8x128xbf16>, vector<128x128xbf16>, vector<8x128xf32> -> vector<8x128xf32>
    %c0_19 = arith.constant 0 : index
    %c0_20 = arith.constant 0 : index
    %27 = vector.load %arg8[%c0_19, %c0_20] : memref<8x128xf32, #tpu.memory_space<vmem>>, vector<8x128xf32>
    tpu.vector_store %arg8[%c0_19, %c0_20], %26 {strides = array<i32>} : memref<8x128xf32, #tpu.memory_space<vmem>>, vector<8x128xf32>,
    return
  }
  func.func @transform_0(%arg0: i32) -> (i32, i32) {
    %c0_i32 = arith.constant 0 : i32
    %c0_i32_0 = arith.constant 0 : i32
    return %arg0, %c0_i32 : i32, i32
  }
  func.func @transform_1(%arg0: i32) -> (i32, i32) {
    %c0_i32 = arith.constant 0 : i32
    %c0_i32_0 = arith.constant 0 : i32
    %c0_i32_1 = arith.constant 0 : i32
    return %c0_i32, %c0_i32_0 : i32, i32
  }
  func.func @transform_2(%arg0: i32) -> (i32, i32) {
    %c0_i32 = arith.constant 0 : i32
    %c0_i32_0 = arith.constant 0 : i32
    %c0_i32_1 = arith.constant 0 : i32
    return %c0_i32, %c0_i32_0 : i32, i32
  }
  func.func @transform_3(%arg0: i32) -> (i32, i32) {
    %c0_i32 = arith.constant 0 : i32
    %c0_i32_0 = arith.constant 0 : i32
    %c0_i32_1 = arith.constant 0 : i32
    return %c0_i32, %c0_i32_0 : i32, i32
  }
  func.func @transform_4(%arg0: i32) -> (i32, i32) {
    %c0_i32 = arith.constant 0 : i32
    %c0_i32_0 = arith.constant 0 : i32
    %c0_i32_1 = arith.constant 0 : i32
    return %c0_i32, %c0_i32_0 : i32, i32
  }
  func.func @transform_5(%arg0: i32) -> (i32, i32) {
    %c0_i32 = arith.constant 0 : i32
    %c0_i32_0 = arith.constant 0 : i32
    %c0_i32_1 = arith.constant 0 : i32
    return %c0_i32, %c0_i32_0 : i32, i32
  }
  func.func @transform_6(%arg0: i32) -> (i32, i32) {
    %c0_i32 = arith.constant 0 : i32
    %c0_i32_0 = arith.constant 0 : i32
    %c0_i32_1 = arith.constant 0 : i32
    return %c0_i32, %c0_i32_0 : i32, i32
  }
  func.func @transform_7(%arg0: i32) -> (i32, i32) {
    %c0_i32 = arith.constant 0 : i32
    %c0_i32_0 = arith.constant 0 : i32
    return %arg0, %c0_i32 : i32, i32
  }
}

module attributes {stable_mosaic.version = 11 : i64} {
  func.func @kernel(%arg0: i32, %arg1: memref<8x128xbf16, #tpu.memory_space<vmem>>, %arg2: memref<128x128xbf16, #tpu.memory_space<vmem>>, %arg3: memref<128x128xbf16, #tpu.memory_space<vmem>>, %arg4: memref<128x128xbf16, #tpu.memory_space<vmem>>, %arg5: memref<1x128xf32, #tpu.memory_space<vmem>>, %arg6: memref<128x128xbf16, #tpu.memory_space<vmem>>, %arg7: memref<1x128xf32, #tpu.memory_space<vmem>>, %arg8: memref<8x128xf32, #tpu.memory_space<vmem>>) attributes {dimension_semantics = [#tpu.dimension_semantics<parallel>], iteration_bounds = array<i64: 1>, scalar_prefetch = 0 : i64, scratch_operands = 0 : i64, tpu.core_type = #tpu.core_type<tc>, window_params = [{transform_indices = @transform_0, window_bounds = array<i64: 8, 128>}, {pipeline_mode = #tpu.pipeline_mode<synchronous>, transform_indices = @transform_1, window_bounds = array<i64: 128, 128>}, {pipeline_mode = #tpu.pipeline_mode<synchronous>, transform_indices = @transform_2, window_bounds = array<i64: 128, 128>}, {pipeline_mode = #tpu.pipeline_mode<synchronous>, transform_indices = @transform_3, window_bounds = array<i64: 128, 128>}, {pipeline_mode = #tpu.pipeline_mode<synchronous>, transform_indices = @transform_4, window_bounds = array<i64: 1, 128>}, {pipeline_mode = #tpu.pipeline_mode<synchronous>, transform_indices = @transform_5, window_bounds = array<i64: 128, 128>}, {pipeline_mode = #tpu.pipeline_mode<synchronous>, transform_indices = @transform_6, window_bounds = array<i64: 1, 128>}, {transform_indices = @transform_7, window_bounds = array<i64: 8, 128>}]} {
    %c0 = arith.constant 0 : index
    %c0_0 = arith.constant 0 : index
    %0 = vector.load %arg1[%c0, %c0_0] : memref<8x128xbf16, #tpu.memory_space<vmem>>, vector<8x128xbf16>
    %c0_1 = arith.constant 0 : index
    %c0_2 = arith.constant 0 : index
    %1 = vector.load %arg2[%c0_1, %c0_2] : memref<128x128xbf16, #tpu.memory_space<vmem>>, vector<128x128xbf16>
    %cst = arith.constant dense<0.000000e+00> : vector<8x128xf32>
    %2 = tpu.matmul %0, %1, %cst {dimension_numbers = #tpu.dot_dimension_numbers<[1], [0], [0], [1], [0, 0, 1, 1], [], []>} : vector<8x128xbf16>, vector<128x128xbf16>, vector<8x128xf32> -> vector<8x128xf32>
    %3 = arith.truncf %2 : vector<8x128xf32> to vector<8x128xbf16>
    %c0_3 = arith.constant 0 : index
    %c0_4 = arith.constant 0 : index
    %4 = vector.load %arg4[%c0_3, %c0_4] : memref<128x128xbf16, #tpu.memory_space<vmem>>, vector<128x128xbf16>
    %cst_5 = arith.constant dense<0.000000e+00> : vector<8x128xf32>
    %5 = tpu.matmul %3, %4, %cst_5 {dimension_numbers = #tpu.dot_dimension_numbers<[1], [0], [0], [1], [0, 0, 1, 1], [], []>} : vector<8x128xbf16>, vector<128x128xbf16>, vector<8x128xf32> -> vector<8x128xf32>
    %c0_6 = arith.constant 0 : index
    %c0_7 = arith.constant 0 : index
    %6 = vector.load %arg5[%c0_6, %c0_7] : memref<1x128xf32, #tpu.memory_space<vmem>>, vector<1x128xf32>
    %7 = vector.broadcast %6 : vector<1x128xf32> to vector<8x128xf32>
    %8 = arith.addf %5, %7 : vector<8x128xf32>
    %cst_8 = arith.constant 0.000000e+00 : f32
    %9 = vector.broadcast %cst_8 : f32 to vector<8x128xf32>
    %10 = arith.maximumf %8, %9 : vector<8x128xf32>
    %11 = arith.truncf %10 : vector<8x128xf32> to vector<8x128xbf16>
    %c0_9 = arith.constant 0 : index
    %c0_10 = arith.constant 0 : index
    %12 = vector.load %arg6[%c0_9, %c0_10] : memref<128x128xbf16, #tpu.memory_space<vmem>>, vector<128x128xbf16>
    %cst_11 = arith.constant dense<0.000000e+00> : vector<8x128xf32>
    %13 = tpu.matmul %11, %12, %cst_11 {dimension_numbers = #tpu.dot_dimension_numbers<[1], [0], [0], [1], [0, 0, 1, 1], [], []>} : vector<8x128xbf16>, vector<128x128xbf16>, vector<8x128xf32> -> vector<8x128xf32>
    %c0_12 = arith.constant 0 : index
    %c0_13 = arith.constant 0 : index
    %14 = vector.load %arg7[%c0_12, %c0_13] : memref<1x128xf32, #tpu.memory_space<vmem>>, vector<1x128xf32>
    %15 = vector.broadcast %14 : vector<1x128xf32> to vector<8x128xf32>
    %16 = arith.addf %13, %15 : vector<8x128xf32>
    %cst_14 = arith.constant 0.000000e+00 : f32
    %17 = vector.broadcast %cst_14 : f32 to vector<8x128xf32>
    %18 = arith.subf %17, %16 : vector<8x128xf32>
    %19 = math.exp %18 : vector<8x128xf32>
    %cst_15 = arith.constant 1.000000e+00 : f32
    %20 = vector.broadcast %cst_15 : f32 to vector<8x128xf32>
    %21 = arith.addf %20, %19 : vector<8x128xf32>
    %22 = tpu.reciprocal %21 {approx = true} : vector<8x128xf32> -> vector<8x128xf32>
    %23 = arith.mulf %2, %22 : vector<8x128xf32>
    %24 = arith.truncf %23 : vector<8x128xf32> to vector<8x128xbf16>
    %c0_16 = arith.constant 0 : index
    %c0_17 = arith.constant 0 : index
    %25 = vector.load %arg3[%c0_16, %c0_17] : memref<128x128xbf16, #tpu.memory_space<vmem>>, vector<128x128xbf16>
    %cst_18 = arith.constant dense<0.000000e+00> : vector<8x128xf32>
    %26 = tpu.matmul %24, %25, %cst_18 {dimension_numbers = #tpu.dot_dimension_numbers<[1], [0], [0], [1], [0, 0, 1, 1], [], []>} : vector<8x128xbf16>, vector<128x128xbf16>, vector<8x128xf32> -> vector<8x128xf32>
    %c0_19 = arith.constant 0 : index
    %c0_20 = arith.constant 0 : index
    %27 = vector.load %arg8[%c0_19, %c0_20] : memref<8x128xf32, #tpu.memory_space<vmem>>, vector<8x128xf32>
    tpu.vector_store %arg8[%c0_19, %c0_20], %26 {strides = array<i32>} : memref<8x128xf32, #tpu.memory_space<vmem>>, vector<8x128xf32>,
    return
  }
  func.func @transform_0(%arg0: i32) -> (i32, i32) {
    %c0_i32 = arith.constant 0 : i32
    %c0_i32_0 = arith.constant 0 : i32
    return %arg0, %c0_i32 : i32, i32
  }
  func.func @transform_1(%arg0: i32) -> (i32, i32) {
    %c0_i32 = arith.constant 0 : i32
    %c0_i32_0 = arith.constant 0 : i32
    %c0_i32_1 = arith.constant 0 : i32
    return %c0_i32, %c0_i32_0 : i32, i32
  }
  func.func @transform_2(%arg0: i32) -> (i32, i32) {
    %c0_i32 = arith.constant 0 : i32
    %c0_i32_0 = arith.constant 0 : i32
    %c0_i32_1 = arith.constant 0 : i32
    return %c0_i32, %c0_i32_0 : i32, i32
  }
  func.func @transform_3(%arg0: i32) -> (i32, i32) {
    %c0_i32 = arith.constant 0 : i32
    %c0_i32_0 = arith.constant 0 : i32
    %c0_i32_1 = arith.constant 0 : i32
    return %c0_i32, %c0_i32_0 : i32, i32
  }
  func.func @transform_4(%arg0: i32) -> (i32, i32) {
    %c0_i32 = arith.constant 0 : i32
    %c0_i32_0 = arith.constant 0 : i32
    %c0_i32_1 = arith.constant 0 : i32
    return %c0_i32, %c0_i32_0 : i32, i32
  }
  func.func @transform_5(%arg0: i32) -> (i32, i32) {
    %c0_i32 = arith.constant 0 : i32
    %c0_i32_0 = arith.constant 0 : i32
    %c0_i32_1 = arith.constant 0 : i32
    return %c0_i32, %c0_i32_0 : i32, i32
  }
  func.func @transform_6(%arg0: i32) -> (i32, i32) {
    %c0_i32 = arith.constant 0 : i32
    %c0_i32_0 = arith.constant 0 : i32
    %c0_i32_1 = arith.constant 0 : i32
    return %c0_i32, %c0_i32_0 : i32, i32
  }
  func.func @transform_7(%arg0: i32) -> (i32, i32) {
    %c0_i32 = arith.constant 0 : i32
    %c0_i32_0 = arith.constant 0 : i32
    return %arg0, %c0_i32 : i32, i32
  }
}

</mosaic_0001>

<bundles_post_ra>
// kernel: tpu_custom_call.1
= control target key start
LH: loop header
LB: loop body
LE: loop exit
PB: predicated region body
PF: predicated region fallthrough
CT: control target
= control target key end

     0   :  { %12 = vsyncpa [#allocation3], 0  ;;  %s1069_s0 = inlined_call_operand.hbm [shape: bf16[8,128], index: 0, kind: input, shape index: {}]   ;;  %s1070_s1 = inlined_call_operand.hbm [shape: bf16[128,128], index: 1, kind: input, shape index: {}]   ;;  %s1071_s2 = inlined_call_operand.hbm [shape: bf16[128,128], index: 2, kind: input, shape index: {}]   ;;  %s1072_s3 = inlined_call_operand.hbm [shape: bf16[128,128], index: 3, kind: input, shape index: {}]   ;;  %s1073_s4 = inlined_call_operand.vmem [shape: f32[1,128], index: 4, kind: input, shape index: {}]   ;;  %s1074_s5 = inlined_call_operand.hbm [shape: bf16[128,128], index: 5, kind: input, shape index: {}]   ;;  %s1075_s6 = inlined_call_operand.vmem [shape: f32[1,128], index: 6, kind: input, shape index: {}]   ;;  %s1076_s7 = inlined_call_operand.hbm [shape: f32[8,128], index: 7, kind: output, shape index: {}]  }
   0x1   :  { %13 = vsyncpa [#allocation6], 0 }
   0x2   :  { %14 = vsyncpa [#allocation9], 0 }
   0x3   :  { %15 = vsyncpa [#allocation4], 0  ;;  %s889_s24 = smov [#allocation5]   ;;  %s749_s28 = scalar_lea.hbm %s1070_s1, 1024 }
   0x4   :  { %s31_s25 = sshll.u32 %s889_s24, 4  ;;  %p750_p0 = scmp.ne.s32.totalorder %s1070_s1, %s749_s28  ;;  %s32_s25 = int_to_ptr.vmem [resolvable:$true] %s31_s25 }
   0x5   :  { %p753_p1 = scmp.lt.u32.totalorder %s749_s28, %s1070_s1 }
   0x7   :  { %p755_p2 = pnand %p753_p1, %p750_p0 }
   0x9   :  { %758 = shalt.err (!%p755_p2)
}
   0xa   :  { %s759_s10 = scalar_lea.vmem %s32_s25, 1024  ;;  %p764_p4 = scmp.lt.s32.totalorder %s32_s25, %s32_s25 }
   0xb   :  { %p760_p3 = scmp.ne.s32.totalorder %s32_s25, %s759_s10  ;;  %p765_p5 = scmp.lt.s32.totalorder %s759_s10, %s759_s10 }
   0xd   :  { %p766_p6 = por %p765_p5, %p764_p4 }
   0xf   :  { %p767_p7 = pnand %p766_p6, %p760_p3 }
  0x11   :  { %770 = shalt.err (!%p767_p7)
}
  0x12   :  { %s890_s11 = smov 64   ;;  %s891_s12 = smov 4  }
  0x13   :  { %37 = dma.hbm_to_vmem [thread:$0]  %s1070_s1, 1024, %s32_s25, [#allocation6], %s890_s11, %s890_s11, %s891_s12  }
  0x14   :  { %s892_s15 = smov [#allocation8]   ;;  %s893_s17 = smov [#allocation2]  }
  0x15   :  { %s55_s16 = sshll.u32 %s892_s15, 4  ;;  %s22_s18 = sshll.u32 %s893_s17, 4  ;;  %s56_s16 = int_to_ptr.vmem [resolvable:$true] %s55_s16  ;;  %s23_s18 = int_to_ptr.vmem [resolvable:$true] %s22_s18 }
  0x16   :  { %s771_s21 = scalar_lea.hbm %s1072_s3, 1024 }
  0x17   :  { %p772_p8 = scmp.ne.s32.totalorder %s1072_s3, %s771_s21  ;;  %p775_p9 = scmp.lt.u32.totalorder %s771_s21, %s1072_s3 }
  0x19   :  { %p777_p10 = pnand %p775_p9, %p772_p8 }
  0x1b   :  { %780 = shalt.err (!%p777_p10)
}
  0x1c   :  { %s781_s1 = scalar_lea.vmem %s56_s16, 1024  ;;  %p786_p12 = scmp.lt.s32.totalorder %s56_s16, %s56_s16 }
  0x1d   :  { %p782_p11 = scmp.ne.s32.totalorder %s56_s16, %s781_s1  ;;  %p787_p13 = scmp.lt.s32.totalorder %s781_s1, %s781_s1 }
  0x1f   :  { %p788_p0 = por %p787_p13, %p786_p12 }
  0x21   :  { %p789_p1 = pnand %p788_p0, %p782_p11 }
  0x23   :  { %792 = shalt.err (!%p789_p1)
}
  0x24   :  { %61 = dma.hbm_to_vmem [thread:$0]  %s1072_s3, 1024, %s56_s16, [#allocation9], %s890_s11, %s890_s11, %s891_s12  }
  0x25   :  { %s793_s30 = scalar_lea.hbm %s1069_s0, 64 }
  0x26   :  { %p794_p2 = scmp.ne.s32.totalorder %s1069_s0, %s793_s30  ;;  %p797_p3 = scmp.lt.u32.totalorder %s793_s30, %s1069_s0 }
  0x28   :  { %p799_p4 = pnand %p797_p3, %p794_p2 }
  0x2a   :  { %802 = shalt.err (!%p799_p4)
}
  0x2b   :  { %s803_s14 = scalar_lea.vmem %s23_s18, 64  ;;  %p808_p6 = scmp.lt.s32.totalorder %s23_s18, %s23_s18 }
  0x2c   :  { %p804_p5 = scmp.ne.s32.totalorder %s23_s18, %s803_s14  ;;  %p809_p7 = scmp.lt.s32.totalorder %s803_s14, %s803_s14 }
  0x2e   :  { %p810_p8 = por %p809_p7, %p808_p6 }
  0x30   :  { %p811_p9 = pnand %p810_p8, %p804_p5 }
  0x32   :  { %814 = shalt.err (!%p811_p9)
}
  0x33   :  { %25 = dma.hbm_to_vmem [thread:$0]  %s1069_s0, 64, %s23_s18, [#allocation3]  }
  0x34   :  { %s894_s16 = smov [#allocation7]   ;;  %s895_s19 = smov [#allocation10]  }
  0x35   :  { %s43_s17 = sshll.u32 %s894_s16, 4  ;;  %s69_s20 = sshll.u32 %s895_s19, 4  ;;  %s44_s17 = int_to_ptr.vmem [resolvable:$true] %s43_s17  ;;  %s70_s20 = int_to_ptr.vmem [resolvable:$true] %s69_s20 }
  0x36   :  { %s815_s23 = scalar_lea.hbm %s1071_s2, 1024 }
  0x37   :  { %p816_p10 = scmp.ne.s32.totalorder %s1071_s2, %s815_s23  ;;  %p819_p11 = scmp.lt.u32.totalorder %s815_s23, %s1071_s2 }
  0x39   :  { %p821_p12 = pnand %p819_p11, %p816_p10 }
  0x3b   :  { %824 = shalt.err (!%p821_p12)
}
  0x3c   :  { %s825_s0 = scalar_lea.vmem %s44_s17, 1024  ;;  %p830_p0 = scmp.lt.s32.totalorder %s44_s17, %s44_s17 }
  0x3d   :  { %p826_p13 = scmp.ne.s32.totalorder %s44_s17, %s825_s0  ;;  %p831_p1 = scmp.lt.s32.totalorder %s825_s0, %s825_s0 }
  0x3f   :  { %p832_p2 = por %p831_p1, %p830_p0 }
  0x41   :  { %p833_p3 = pnand %p832_p2, %p826_p13 }
  0x43   :  { %836 = shalt.err (!%p833_p3)
}
  0x44   :  { %49 = dma.hbm_to_vmem [thread:$0]  %s1071_s2, 1024, %s44_s17, [#allocation6], %s890_s11, %s890_s11, %s891_s12  }
  0x45   :  { %s837_s30 = scalar_lea.hbm %s1074_s5, 1024 }
  0x46   :  { %p838_p4 = scmp.ne.s32.totalorder %s1074_s5, %s837_s30  ;;  %p841_p5 = scmp.lt.u32.totalorder %s837_s30, %s1074_s5 }
  0x48   :  { %p843_p6 = pnand %p841_p5, %p838_p4 }
  0x4a   :  { %846 = shalt.err (!%p843_p6)
}
  0x4b   :  { %s847_s14 = scalar_lea.vmem %s70_s20, 1024  ;;  %p852_p8 = scmp.lt.s32.totalorder %s70_s20, %s70_s20 }
  0x4c   :  { %p848_p7 = scmp.ne.s32.totalorder %s70_s20, %s847_s14  ;;  %p853_p9 = scmp.lt.s32.totalorder %s847_s14, %s847_s14 }
  0x4e   :  { %p854_p10 = por %p853_p9, %p852_p8 }
  0x50   :  { %p855_p11 = pnand %p854_p10, %p848_p7 }
  0x52   :  { %858 = shalt.err (!%p855_p11)
}
  0x53   :  { %75 = dma.hbm_to_vmem [thread:$0]  %s1074_s5, 1024, %s70_s20, [#allocation9], %s890_s11, %s890_s11, %s891_s12  }
  0x54   :  { %881 = dma.done.wait [#allocation3], 64  }
  0x55   :  { %882 = vsyncadd [#allocation3], 4294967232 }
  0x56   :  { %883 = dma.done.wait [#allocation6], 2048  }
  0x57   :  { %884 = vsyncadd [#allocation6], 4294965248 }
  0x58   :  { %885 = dma.done.wait [#allocation9], 2048  }
  0x59   :  { %886 = vsyncadd [#allocation9], 4294965248  ;;  %v896_v0 = vmov 0.0   ;;  %vm897_vm0 = vmmov 0   ;;  %v713_v1 = vld [vmem:[#allocation5] sm:$0xff]   ;;  %v714_v2 = vld [vmem:[#allocation5 + $0x8] sm:$0xff]  }
  0x5a   :  { %623 = vmatprep.subr.bf16.mxu0 %v896_v0  ;;  %639 = vmatprep.mubr.msk.bf16.mxu0 %vm897_vm0, %v896_v0  ;;  %v715_v3 = vld [vmem:[#allocation5 + $0x10] sm:$0xff]   ;;  %v721_v4 = vld [vmem:[#allocation8] sm:$0xff]   ;;  %v716_v5 = vld [vmem:[#allocation5 + $0x18] sm:$0xff]   ;;  %s898_s15 = smov [#allocation11]  }
  0x5b   :  { %643 = vmatprep.subr.bf16.mxu1 %v896_v0  ;;  %659 = vmatprep.mubr.msk.bf16.mxu1 %vm897_vm0, %v896_v0  ;;  %v722_v6 = vld [vmem:[#allocation8 + $0x8] sm:$0xff]   ;;  %v717_v7 = vld [vmem:[#allocation5 + $0x20] sm:$0xff]   ;;  %v723_v8 = vld [vmem:[#allocation8 + $0x10] sm:$0xff]   ;;  %s542_s16 = sshll.u32 %s898_s15, 4  ;;  %s543_s16 = int_to_ptr.vmem [resolvable:$true] %s542_s16 }
  0x5c   :  { %624 = vmatpush3.bf16.msra.mxu0 %v713_v1  ;;  %644 = vmatpush3.bf16.msra.mxu1 %v721_v4  ;;  %v718_v9 = vld [vmem:[#allocation5 + $0x28] sm:$0xff]   ;;  %v724_v10 = vld [vmem:[#allocation8 + $0x18] sm:$0xff]   ;;  %v719_v11 = vld [vmem:[#allocation5 + $0x30] sm:$0xff]   ;;  %p864_p13 = scmp.lt.s32.totalorder %s543_s16, %s543_s16 }
  0x5d   :  { %625 = vmatprep.subr.bf16.mxu0 %v896_v0  ;;  %645 = vmatprep.subr.bf16.mxu1 %v896_v0  ;;  %v725_v12 = vld [vmem:[#allocation8 + $0x20] sm:$0xff]   ;;  %v720_v13 = vld [vmem:[#allocation5 + $0x38] sm:$0xff]   ;;  %v726_v14 = vld [vmem:[#allocation8 + $0x28] sm:$0xff]  }
  0x5e   :  { %v94_v15 = vld [vmem:[#allocation2] sm:$0xf]  ;;  %v727_v16 = vld [vmem:[#allocation8 + $0x30] sm:$0xff]   ;;  %v729_v18 = vld [vmem:[#allocation10] sm:$0xff]  }
  0x5f   :  { %v728_v17 = vld [vmem:[#allocation8 + $0x38] sm:$0xff]   ;;  %v730_v19 = vld [vmem:[#allocation10 + $0x8] sm:$0xff]   ;;  %v731_v20 = vld [vmem:[#allocation10 + $0x10] sm:$0xff]  }
  0x60   :  { %626 = vmatpush3.bf16.msra.mxu0 %v714_v2  ;;  %646 = vmatpush3.bf16.msra.mxu1 %v722_v6  ;;  %v732_v21 = vld [vmem:[#allocation10 + $0x18] sm:$0xff]   ;;  %v733_v22 = vld [vmem:[#allocation10 + $0x20] sm:$0xff]   ;;  %v734_v23 = vld [vmem:[#allocation10 + $0x28] sm:$0xff]  }
  0x61   :  { %627 = vmatprep.subr.bf16.mxu0 %v896_v0  ;;  %647 = vmatprep.subr.bf16.mxu1 %v896_v0  ;;  %v735_v29 = vld [vmem:[#allocation10 + $0x30] sm:$0xff]   ;;  %v736_v30 = vld [vmem:[#allocation10 + $0x38] sm:$0xff]   ;;  %v737_v39 = vld [vmem:[#allocation7] sm:$0xff]  }
  0x62   :  { %v561_v31 = vld [vmem:[%s1073_s4] ss:$0 sm:$0xff]  ;;  %v738_v40 = vld [vmem:[#allocation7 + $0x8] sm:$0xff]   ;;  %v739_v41 = vld [vmem:[#allocation7 + $0x10] sm:$0xff]  }
  0x63   :  { %v740_v42 = vld [vmem:[#allocation7 + $0x18] sm:$0xff]   ;;  %v741_v43 = vld [vmem:[#allocation7 + $0x20] sm:$0xff]   ;;  %v742_v44 = vld [vmem:[#allocation7 + $0x28] sm:$0xff]  }
  0x64   :  { %628 = vmatpush3.bf16.msra.mxu0 %v715_v3  ;;  %648 = vmatpush3.bf16.msra.mxu1 %v723_v8  ;;  %v743_v45 = vld [vmem:[#allocation7 + $0x30] sm:$0xff]   ;;  %v744_v46 = vld [vmem:[#allocation7 + $0x38] sm:$0xff]  }
  0x65   :  { %629 = vmatprep.subr.bf16.mxu0 %v896_v0  ;;  %649 = vmatprep.subr.bf16.mxu1 %v896_v0  ;;  %v570_v47 = vld [vmem:[%s1075_s6] ss:$0 sm:$0xff]  ;;  %s859_s6 = scalar_lea.vmem %s543_s16, 128 }
  0x66   :  { %p860_p12 = scmp.ne.s32.totalorder %s543_s16, %s859_s6  ;;  %p865_p0 = scmp.lt.s32.totalorder %s859_s6, %s859_s6 }
  0x68   :  { %630 = vmatpush3.bf16.msra.mxu0 %v716_v5  ;;  %650 = vmatpush3.bf16.msra.mxu1 %v724_v10  ;;  %p866_p1 = por %p865_p0, %p864_p13 }
  0x69   :  { %631 = vmatprep.subr.bf16.mxu0 %v896_v0  ;;  %651 = vmatprep.subr.bf16.mxu1 %v896_v0 }
  0x6a   :  { %p867_p2 = pnand %p866_p1, %p860_p12 }
  0x6c   :  { %632 = vmatpush3.bf16.msra.mxu0 %v717_v7  ;;  %652 = vmatpush3.bf16.msra.mxu1 %v725_v12 }
  0x6d   :  { %633 = vmatprep.subr.bf16.mxu0 %v896_v0  ;;  %653 = vmatprep.subr.bf16.mxu1 %v896_v0 }
  0x70   :  { %634 = vmatpush3.bf16.msra.mxu0 %v718_v9  ;;  %654 = vmatpush3.bf16.msra.mxu1 %v726_v14 }
  0x71   :  { %635 = vmatprep.subr.bf16.mxu0 %v896_v0  ;;  %655 = vmatprep.subr.bf16.mxu1 %v896_v0 }
  0x74   :  { %636 = vmatpush3.bf16.msra.mxu0 %v719_v11  ;;  %656 = vmatpush3.bf16.msra.mxu1 %v727_v16 }
  0x75   :  { %637 = vmatprep.subr.bf16.mxu0 %v896_v0  ;;  %657 = vmatprep.subr.bf16.mxu1 %v896_v0 }
  0x78   :  { %638 = vmatpush3.bf16.msra.mxu0 %v720_v13  ;;  %658 = vmatpush3.bf16.msra.mxu1 %v728_v17 }
  0x79   :  { %663 = vmatprep.subr.bf16.mxu0 %v896_v0  ;;  %683 = vmatprep.subr.bf16.mxu1 %v896_v0 }
  0x7b   :  { %640 = vmatmul.mubr.bf16.vlgmr.msra.gmra.mrb[0].mxu0 %v94_v15 }
  0x7c   :  { %679 = vmatprep.mubr.msk.bf16.mxu0 %vm897_vm0, %v896_v0  ;;  %664 = vmatpush3.bf16.msra.mxu0 %v729_v18 }
  0x7d   :  { %665 = vmatprep.subr.bf16.mxu0 %v896_v0 }
  0x80   :  { %666 = vmatpush3.bf16.msra.mxu0 %v730_v19 }
  0x81   :  { %667 = vmatprep.subr.bf16.mxu0 %v896_v0 }
  0x84   :  { %668 = vmatpush3.bf16.msra.mxu0 %v731_v20 }
  0x85   :  { %669 = vmatprep.subr.bf16.mxu0 %v896_v0 }
  0x88   :  { %670 = vmatpush3.bf16.msra.mxu0 %v732_v21 }
  0x89   :  { %671 = vmatprep.subr.bf16.mxu0 %v896_v0 }
  0x8c   :  { %672 = vmatpush3.bf16.msra.mxu0 %v733_v22 }
  0x8d   :  { %673 = vmatprep.subr.bf16.mxu0 %v896_v0 }
  0x90   :  { %674 = vmatpush3.bf16.msra.mxu0 %v734_v23 }
  0x91   :  { %675 = vmatprep.subr.bf16.mxu0 %v896_v0 }
  0x94   :  { %676 = vmatpush3.bf16.msra.mxu0 %v735_v29 }
  0x95   :  { %677 = vmatprep.subr.bf16.mxu0 %v896_v0 }
  0x98   :  { %678 = vmatpush3.bf16.msra.mxu0 %v736_v30 }
 0x14e   :  { %v193_v24 = vpop.f32.mrb[0].mxu0 }
 0x14f   :  { %v199_v25 = vpack.c.bf16 %v193_v24, %v193_v24  ;;  %v641_v26 = vpop.f32.mrb[1].mxu0 }
 0x150   :  { %v196_v27 = vpop.f32.mrb[2].mxu0 }
 0x151   :  { %v642_v28 = vpop.f32.mrb[3].mxu0  ;;  %660 = vmatmul.mubr.bf16.vlgmr.msra.gmra.mrb[0].mxu1 %v199_v25 }
 0x152   :  { %699 = vmatprep.mubr.msk.bf16.mxu1 %vm897_vm0, %v896_v0  ;;  %684 = vmatpush3.bf16.msra.mxu1 %v737_v39 }
 0x153   :  { %685 = vmatprep.subr.bf16.mxu1 %v896_v0 }
 0x156   :  { %686 = vmatpush3.bf16.msra.mxu1 %v738_v40 }
 0x157   :  { %687 = vmatprep.subr.bf16.mxu1 %v896_v0 }
 0x15a   :  { %688 = vmatpush3.bf16.msra.mxu1 %v739_v41 }
 0x15b   :  { %689 = vmatprep.subr.bf16.mxu1 %v896_v0 }
 0x15e   :  { %690 = vmatpush3.bf16.msra.mxu1 %v740_v42 }
 0x15f   :  { %691 = vmatprep.subr.bf16.mxu1 %v896_v0 }
 0x162   :  { %692 = vmatpush3.bf16.msra.mxu1 %v741_v43 }
 0x163   :  { %693 = vmatprep.subr.bf16.mxu1 %v896_v0 }
 0x166   :  { %694 = vmatpush3.bf16.msra.mxu1 %v742_v44 }
 0x167   :  { %695 = vmatprep.subr.bf16.mxu1 %v896_v0 }
 0x16a   :  { %696 = vmatpush3.bf16.msra.mxu1 %v743_v45 }
 0x16b   :  { %697 = vmatprep.subr.bf16.mxu1 %v896_v0 }
 0x16e   :  { %698 = vmatpush3.bf16.msra.mxu1 %v744_v46 }
 0x224   :  { %v305_v32 = vpop.f32.mrb[0].mxu1 }
 0x225   :  { %v306_v33 = vadd.f32 %v561_v31, %v305_v32  ;;  %v661_v34 = vpop.f32.mrb[1].mxu1 }
 0x226   :  { %v308_v35 = vpop.f32.mrb[2].mxu1 }
 0x227   :  { %v311_v36 = vmax.f32 %v306_v33, 0.0  ;;  %v662_v37 = vpop.f32.mrb[3].mxu1 }
 0x229   :  { %v312_v38 = vpack.c.bf16 %v311_v36, %v311_v36 }
 0x22b   :  { %680 = vmatmul.mubr.bf16.vlgmr.msra.gmra.mrb[4].mxu0 %v312_v38 }
 0x2fe   :  { %v418_v48 = vpop.f32.mrb[4].mxu0 }
 0x2ff   :  { %v419_v49 = vadd.f32 %v570_v47, %v418_v48  ;;  %v681_v50 = vpop.f32.mrb[5].mxu0 }
 0x300   :  { %v421_v51 = vpop.f32.mrb[6].mxu0 }
 0x301   :  { %v424_v52 = vsub.f32 0.0, %v419_v49  ;;  %v682_v53 = vpop.f32.mrb[7].mxu0 }
 0x303   :  { %v425_v54 = vmul.f32 1.442695, %v424_v52 }
 0x305   :  { %745 = vpow2.f32 %v425_v54 }
 0x30f   :  { %v746_v55 = vpop.eup %745 }
 0x310   :  { %v427_v56 = vadd.f32 1.0, %v746_v55 }
 0x312   :  { %747 = vrcp.f32 %v427_v56 }
 0x31c   :  { %v748_v57 = vpop.eup %747 }
 0x31d   :  { %v429_v58 = vmul.f32 %v748_v57, %v193_v24 }
 0x31f   :  { %v430_v59 = vpack.c.bf16 %v429_v58, %v429_v58 }
 0x321   :  { %700 = vmatmul.mubr.bf16.vlgmr.msra.gmra.mrb[4].mxu1 %v430_v59 }
 0x3f4   :  { %v529_v60 = vpop.f32.mrb[4].mxu1 }
 0x3f5   :  { %535 = vst [vmem:[#allocation11] sm:$0xff] %v529_v60  ;;  %v701_v61 = vpop.f32.mrb[5].mxu1 }
 0x3f6   :  { %v532_v62 = vpop.f32.mrb[6].mxu1 }
 0x3f7   :  { %870 = shalt.err (!%p867_p2)
}
 0x3f8   :  { %s871_s20 = scalar_lea.hbm %s1076_s7, 128 }
 0x3f9   :  { %p872_p3 = scmp.ne.s32.totalorder %s1076_s7, %s871_s20  ;;  %p875_p4 = scmp.lt.u32.totalorder %s871_s20, %s1076_s7 }
 0x3fb   :  { %p877_p5 = pnand %p875_p4, %p872_p3 }
 0x3fd   :  { %880 = shalt.err (!%p877_p5)
}
 0x3fe   :  { %545 = dma.vmem_to_hbm [thread:$0]  %s543_s16, 128, %s1076_s7, [#allocation4]   ;;  %v702_v63 = vpop.f32.mrb[7].mxu1 }
 0x3ff   :  { %887 = dma.done.wait [#allocation4], 128  }
 0x400   :  { %888 = vsyncadd [#allocation4], 4294967168 }
 0x401   :  { %549 = vsyncpa [#allocation3], 1 }
 0x402   :  { %550 = vsyncpa [#allocation6], 1 }
 0x403   :  { %551 = vsyncpa [#allocation9], 1 }
 0x404   :  { %552 = vsyncpa [#allocation4], 1 }

// kernel: tpu_custom_call.1
= control target key start
LH: loop header
LB: loop body
LE: loop exit
PB: predicated region body
PF: predicated region fallthrough
CT: control target
= control target key end

     0   :  { %12 = vsyncpa [#allocation3], 0  ;;  %s1069_s0 = inlined_call_operand.hbm [shape: bf16[8,128], index: 0, kind: input, shape index: {}]   ;;  %s1070_s1 = inlined_call_operand.hbm [shape: bf16[128,128], index: 1, kind: input, shape index: {}]   ;;  %s1071_s2 = inlined_call_operand.hbm [shape: bf16[128,128], index: 2, kind: input, shape index: {}]   ;;  %s1072_s3 = inlined_call_operand.hbm [shape: bf16[128,128], index: 3, kind: input, shape index: {}]   ;;  %s1073_s4 = inlined_call_operand.vmem [shape: f32[1,128], index: 4, kind: input, shape index: {}]   ;;  %s1074_s5 = inlined_call_operand.hbm [shape: bf16[128,128], index: 5, kind: input, shape index: {}]   ;;  %s1075_s6 = inlined_call_operand.vmem [shape: f32[1,128], index: 6, kind: input, shape index: {}]   ;;  %s1076_s7 = inlined_call_operand.hbm [shape: f32[8,128], index: 7, kind: output, shape index: {}]  }
   0x1   :  { %13 = vsyncpa [#allocation6], 0 }
   0x2   :  { %14 = vsyncpa [#allocation9], 0 }
   0x3   :  { %15 = vsyncpa [#allocation4], 0  ;;  %s889_s24 = smov [#allocation5]   ;;  %s749_s28 = scalar_lea.hbm %s1070_s1, 1024 }
   0x4   :  { %s31_s25 = sshll.u32 %s889_s24, 4  ;;  %p750_p0 = scmp.ne.s32.totalorder %s1070_s1, %s749_s28  ;;  %s32_s25 = int_to_ptr.vmem [resolvable:$true] %s31_s25 }
   0x5   :  { %p753_p1 = scmp.lt.u32.totalorder %s749_s28, %s1070_s1 }
   0x7   :  { %p755_p2 = pnand %p753_p1, %p750_p0 }
   0x9   :  { %758 = shalt.err (!%p755_p2)
}
   0xa   :  { %s759_s10 = scalar_lea.vmem %s32_s25, 1024  ;;  %p764_p4 = scmp.lt.s32.totalorder %s32_s25, %s32_s25 }
   0xb   :  { %p760_p3 = scmp.ne.s32.totalorder %s32_s25, %s759_s10  ;;  %p765_p5 = scmp.lt.s32.totalorder %s759_s10, %s759_s10 }
   0xd   :  { %p766_p6 = por %p765_p5, %p764_p4 }
   0xf   :  { %p767_p7 = pnand %p766_p6, %p760_p3 }
  0x11   :  { %770 = shalt.err (!%p767_p7)
}
  0x12   :  { %s890_s11 = smov 64   ;;  %s891_s12 = smov 4  }
  0x13   :  { %37 = dma.hbm_to_vmem [thread:$0]  %s1070_s1, 1024, %s32_s25, [#allocation6], %s890_s11, %s890_s11, %s891_s12  }
  0x14   :  { %s892_s15 = smov [#allocation8]   ;;  %s893_s17 = smov [#allocation2]  }
  0x15   :  { %s55_s16 = sshll.u32 %s892_s15, 4  ;;  %s22_s18 = sshll.u32 %s893_s17, 4  ;;  %s56_s16 = int_to_ptr.vmem [resolvable:$true] %s55_s16  ;;  %s23_s18 = int_to_ptr.vmem [resolvable:$true] %s22_s18 }
  0x16   :  { %s771_s21 = scalar_lea.hbm %s1072_s3, 1024 }
  0x17   :  { %p772_p8 = scmp.ne.s32.totalorder %s1072_s3, %s771_s21  ;;  %p775_p9 = scmp.lt.u32.totalorder %s771_s21, %s1072_s3 }
  0x19   :  { %p777_p10 = pnand %p775_p9, %p772_p8 }
  0x1b   :  { %780 = shalt.err (!%p777_p10)
}
  0x1c   :  { %s781_s1 = scalar_lea.vmem %s56_s16, 1024  ;;  %p786_p12 = scmp.lt.s32.totalorder %s56_s16, %s56_s16 }
  0x1d   :  { %p782_p11 = scmp.ne.s32.totalorder %s56_s16, %s781_s1  ;;  %p787_p13 = scmp.lt.s32.totalorder %s781_s1, %s781_s1 }
  0x1f   :  { %p788_p0 = por %p787_p13, %p786_p12 }
  0x21   :  { %p789_p1 = pnand %p788_p0, %p782_p11 }
  0x23   :  { %792 = shalt.err (!%p789_p1)
}
  0x24   :  { %61 = dma.hbm_to_vmem [thread:$0]  %s1072_s3, 1024, %s56_s16, [#allocation9], %s890_s11, %s890_s11, %s891_s12  }
  0x25   :  { %s793_s30 = scalar_lea.hbm %s1069_s0, 64 }
  0x26   :  { %p794_p2 = scmp.ne.s32.totalorder %s1069_s0, %s793_s30  ;;  %p797_p3 = scmp.lt.u32.totalorder %s793_s30, %s1069_s0 }
  0x28   :  { %p799_p4 = pnand %p797_p3, %p794_p2 }
  0x2a   :  { %802 = shalt.err (!%p799_p4)
}
  0x2b   :  { %s803_s14 = scalar_lea.vmem %s23_s18, 64  ;;  %p808_p6 = scmp.lt.s32.totalorder %s23_s18, %s23_s18 }
  0x2c   :  { %p804_p5 = scmp.ne.s32.totalorder %s23_s18, %s803_s14  ;;  %p809_p7 = scmp.lt.s32.totalorder %s803_s14, %s803_s14 }
  0x2e   :  { %p810_p8 = por %p809_p7, %p808_p6 }
  0x30   :  { %p811_p9 = pnand %p810_p8, %p804_p5 }
  0x32   :  { %814 = shalt.err (!%p811_p9)
}
  0x33   :  { %25 = dma.hbm_to_vmem [thread:$0]  %s1069_s0, 64, %s23_s18, [#allocation3]  }
  0x34   :  { %s894_s16 = smov [#allocation7]   ;;  %s895_s19 = smov [#allocation10]  }
  0x35   :  { %s43_s17 = sshll.u32 %s894_s16, 4  ;;  %s69_s20 = sshll.u32 %s895_s19, 4  ;;  %s44_s17 = int_to_ptr.vmem [resolvable:$true] %s43_s17  ;;  %s70_s20 = int_to_ptr.vmem [resolvable:$true] %s69_s20 }
  0x36   :  { %s815_s23 = scalar_lea.hbm %s1071_s2, 1024 }
  0x37   :  { %p816_p10 = scmp.ne.s32.totalorder %s1071_s2, %s815_s23  ;;  %p819_p11 = scmp.lt.u32.totalorder %s815_s23, %s1071_s2 }
  0x39   :  { %p821_p12 = pnand %p819_p11, %p816_p10 }
  0x3b   :  { %824 = shalt.err (!%p821_p12)
}
  0x3c   :  { %s825_s0 = scalar_lea.vmem %s44_s17, 1024  ;;  %p830_p0 = scmp.lt.s32.totalorder %s44_s17, %s44_s17 }
  0x3d   :  { %p826_p13 = scmp.ne.s32.totalorder %s44_s17, %s825_s0  ;;  %p831_p1 = scmp.lt.s32.totalorder %s825_s0, %s825_s0 }
  0x3f   :  { %p832_p2 = por %p831_p1, %p830_p0 }
  0x41   :  { %p833_p3 = pnand %p832_p2, %p826_p13 }
  0x43   :  { %836 = shalt.err (!%p833_p3)
}
  0x44   :  { %49 = dma.hbm_to_vmem [thread:$0]  %s1071_s2, 1024, %s44_s17, [#allocation6], %s890_s11, %s890_s11, %s891_s12  }
  0x45   :  { %s837_s30 = scalar_lea.hbm %s1074_s5, 1024 }
  0x46   :  { %p838_p4 = scmp.ne.s32.totalorder %s1074_s5, %s837_s30  ;;  %p841_p5 = scmp.lt.u32.totalorder %s837_s30, %s1074_s5 }
  0x48   :  { %p843_p6 = pnand %p841_p5, %p838_p4 }
  0x4a   :  { %846 = shalt.err (!%p843_p6)
}
  0x4b   :  { %s847_s14 = scalar_lea.vmem %s70_s20, 1024  ;;  %p852_p8 = scmp.lt.s32.totalorder %s70_s20, %s70_s20 }
  0x4c   :  { %p848_p7 = scmp.ne.s32.totalorder %s70_s20, %s847_s14  ;;  %p853_p9 = scmp.lt.s32.totalorder %s847_s14, %s847_s14 }
  0x4e   :  { %p854_p10 = por %p853_p9, %p852_p8 }
  0x50   :  { %p855_p11 = pnand %p854_p10, %p848_p7 }
  0x52   :  { %858 = shalt.err (!%p855_p11)
}
  0x53   :  { %75 = dma.hbm_to_vmem [thread:$0]  %s1074_s5, 1024, %s70_s20, [#allocation9], %s890_s11, %s890_s11, %s891_s12  }
  0x54   :  { %881 = dma.done.wait [#allocation3], 64  }
  0x55   :  { %882 = vsyncadd [#allocation3], 4294967232 }
  0x56   :  { %883 = dma.done.wait [#allocation6], 2048  }
  0x57   :  { %884 = vsyncadd [#allocation6], 4294965248 }
  0x58   :  { %885 = dma.done.wait [#allocation9], 2048  }
  0x59   :  { %886 = vsyncadd [#allocation9], 4294965248  ;;  %v896_v0 = vmov 0.0   ;;  %vm897_vm0 = vmmov 0   ;;  %v713_v1 = vld [vmem:[#allocation5] sm:$0xff]   ;;  %v714_v2 = vld [vmem:[#allocation5 + $0x8] sm:$0xff]  }
  0x5a   :  { %623 = vmatprep.subr.bf16.mxu0 %v896_v0  ;;  %639 = vmatprep.mubr.msk.bf16.mxu0 %vm897_vm0, %v896_v0  ;;  %v715_v3 = vld [vmem:[#allocation5 + $0x10] sm:$0xff]   ;;  %v721_v4 = vld [vmem:[#allocation8] sm:$0xff]   ;;  %v716_v5 = vld [vmem:[#allocation5 + $0x18] sm:$0xff]   ;;  %s898_s15 = smov [#allocation11]  }
  0x5b   :  { %643 = vmatprep.subr.bf16.mxu1 %v896_v0  ;;  %659 = vmatprep.mubr.msk.bf16.mxu1 %vm897_vm0, %v896_v0  ;;  %v722_v6 = vld [vmem:[#allocation8 + $0x8] sm:$0xff]   ;;  %v717_v7 = vld [vmem:[#allocation5 + $0x20] sm:$0xff]   ;;  %v723_v8 = vld [vmem:[#allocation8 + $0x10] sm:$0xff]   ;;  %s542_s16 = sshll.u32 %s898_s15, 4  ;;  %s543_s16 = int_to_ptr.vmem [resolvable:$true] %s542_s16 }
  0x5c   :  { %624 = vmatpush3.bf16.msra.mxu0 %v713_v1  ;;  %644 = vmatpush3.bf16.msra.mxu1 %v721_v4  ;;  %v718_v9 = vld [vmem:[#allocation5 + $0x28] sm:$0xff]   ;;  %v724_v10 = vld [vmem:[#allocation8 + $0x18] sm:$0xff]   ;;  %v719_v11 = vld [vmem:[#allocation5 + $0x30] sm:$0xff]   ;;  %p864_p13 = scmp.lt.s32.totalorder %s543_s16, %s543_s16 }
  0x5d   :  { %625 = vmatprep.subr.bf16.mxu0 %v896_v0  ;;  %645 = vmatprep.subr.bf16.mxu1 %v896_v0  ;;  %v725_v12 = vld [vmem:[#allocation8 + $0x20] sm:$0xff]   ;;  %v720_v13 = vld [vmem:[#allocation5 + $0x38] sm:$0xff]   ;;  %v726_v14 = vld [vmem:[#allocation8 + $0x28] sm:$0xff]  }
  0x5e   :  { %v94_v15 = vld [vmem:[#allocation2] sm:$0xf]  ;;  %v727_v16 = vld [vmem:[#allocation8 + $0x30] sm:$0xff]   ;;  %v729_v18 = vld [vmem:[#allocation10] sm:$0xff]  }
  0x5f   :  { %v728_v17 = vld [vmem:[#allocation8 + $0x38] sm:$0xff]   ;;  %v730_v19 = vld [vmem:[#allocation10 + $0x8] sm:$0xff]   ;;  %v731_v20 = vld [vmem:[#allocation10 + $0x10] sm:$0xff]  }
  0x60   :  { %626 = vmatpush3.bf16.msra.mxu0 %v714_v2  ;;  %646 = vmatpush3.bf16.msra.mxu1 %v722_v6  ;;  %v732_v21 = vld [vmem:[#allocation10 + $0x18] sm:$0xff]   ;;  %v733_v22 = vld [vmem:[#allocation10 + $0x20] sm:$0xff]   ;;  %v734_v23 = vld [vmem:[#allocation10 + $0x28] sm:$0xff]  }
  0x61   :  { %627 = vmatprep.subr.bf16.mxu0 %v896_v0  ;;  %647 = vmatprep.subr.bf16.mxu1 %v896_v0  ;;  %v735_v29 = vld [vmem:[#allocation10 + $0x30] sm:$0xff]   ;;  %v736_v30 = vld [vmem:[#allocation10 + $0x38] sm:$0xff]   ;;  %v737_v39 = vld [vmem:[#allocation7] sm:$0xff]  }
  0x62   :  { %v561_v31 = vld [vmem:[%s1073_s4] ss:$0 sm:$0xff]  ;;  %v738_v40 = vld [vmem:[#allocation7 + $0x8] sm:$0xff]   ;;  %v739_v41 = vld [vmem:[#allocation7 + $0x10] sm:$0xff]  }
  0x63   :  { %v740_v42 = vld [vmem:[#allocation7 + $0x18] sm:$0xff]   ;;  %v741_v43 = vld [vmem:[#allocation7 + $0x20] sm:$0xff]   ;;  %v742_v44 = vld [vmem:[#allocation7 + $0x28] sm:$0xff]  }
  0x64   :  { %628 = vmatpush3.bf16.msra.mxu0 %v715_v3  ;;  %648 = vmatpush3.bf16.msra.mxu1 %v723_v8  ;;  %v743_v45 = vld [vmem:[#allocation7 + $0x30] sm:$0xff]   ;;  %v744_v46 = vld [vmem:[#allocation7 + $0x38] sm:$0xff]  }
  0x65   :  { %629 = vmatprep.subr.bf16.mxu0 %v896_v0  ;;  %649 = vmatprep.subr.bf16.mxu1 %v896_v0  ;;  %v570_v47 = vld [vmem:[%s1075_s6] ss:$0 sm:$0xff]  ;;  %s859_s6 = scalar_lea.vmem %s543_s16, 128 }
  0x66   :  { %p860_p12 = scmp.ne.s32.totalorder %s543_s16, %s859_s6  ;;  %p865_p0 = scmp.lt.s32.totalorder %s859_s6, %s859_s6 }
  0x68   :  { %630 = vmatpush3.bf16.msra.mxu0 %v716_v5  ;;  %650 = vmatpush3.bf16.msra.mxu1 %v724_v10  ;;  %p866_p1 = por %p865_p0, %p864_p13 }
  0x69   :  { %631 = vmatprep.subr.bf16.mxu0 %v896_v0  ;;  %651 = vmatprep.subr.bf16.mxu1 %v896_v0 }
  0x6a   :  { %p867_p2 = pnand %p866_p1, %p860_p12 }
  0x6c   :  { %632 = vmatpush3.bf16.msra.mxu0 %v717_v7  ;;  %652 = vmatpush3.bf16.msra.mxu1 %v725_v12 }
  0x6d   :  { %633 = vmatprep.subr.bf16.mxu0 %v896_v0  ;;  %653 = vmatprep.subr.bf16.mxu1 %v896_v0 }
  0x70   :  { %634 = vmatpush3.bf16.msra.mxu0 %v718_v9  ;;  %654 = vmatpush3.bf16.msra.mxu1 %v726_v14 }
  0x71   :  { %635 = vmatprep.subr.bf16.mxu0 %v896_v0  ;;  %655 = vmatprep.subr.bf16.mxu1 %v896_v0 }
  0x74   :  { %636 = vmatpush3.bf16.msra.mxu0 %v719_v11  ;;  %656 = vmatpush3.bf16.msra.mxu1 %v727_v16 }
  0x75   :  { %637 = vmatprep.subr.bf16.mxu0 %v896_v0  ;;  %657 = vmatprep.subr.bf16.mxu1 %v896_v0 }
  0x78   :  { %638 = vmatpush3.bf16.msra.mxu0 %v720_v13  ;;  %658 = vmatpush3.bf16.msra.mxu1 %v728_v17 }
  0x79   :  { %663 = vmatprep.subr.bf16.mxu0 %v896_v0  ;;  %683 = vmatprep.subr.bf16.mxu1 %v896_v0 }
  0x7b   :  { %640 = vmatmul.mubr.bf16.vlgmr.msra.gmra.mrb[0].mxu0 %v94_v15 }
  0x7c   :  { %679 = vmatprep.mubr.msk.bf16.mxu0 %vm897_vm0, %v896_v0  ;;  %664 = vmatpush3.bf16.msra.mxu0 %v729_v18 }
  0x7d   :  { %665 = vmatprep.subr.bf16.mxu0 %v896_v0 }
  0x80   :  { %666 = vmatpush3.bf16.msra.mxu0 %v730_v19 }
  0x81   :  { %667 = vmatprep.subr.bf16.mxu0 %v896_v0 }
  0x84   :  { %668 = vmatpush3.bf16.msra.mxu0 %v731_v20 }
  0x85   :  { %669 = vmatprep.subr.bf16.mxu0 %v896_v0 }
  0x88   :  { %670 = vmatpush3.bf16.msra.mxu0 %v732_v21 }
  0x89   :  { %671 = vmatprep.subr.bf16.mxu0 %v896_v0 }
  0x8c   :  { %672 = vmatpush3.bf16.msra.mxu0 %v733_v22 }
  0x8d   :  { %673 = vmatprep.subr.bf16.mxu0 %v896_v0 }
  0x90   :  { %674 = vmatpush3.bf16.msra.mxu0 %v734_v23 }
  0x91   :  { %675 = vmatprep.subr.bf16.mxu0 %v896_v0 }
  0x94   :  { %676 = vmatpush3.bf16.msra.mxu0 %v735_v29 }
  0x95   :  { %677 = vmatprep.subr.bf16.mxu0 %v896_v0 }
  0x98   :  { %678 = vmatpush3.bf16.msra.mxu0 %v736_v30 }
 0x14e   :  { %v193_v24 = vpop.f32.mrb[0].mxu0 }
 0x14f   :  { %v199_v25 = vpack.c.bf16 %v193_v24, %v193_v24  ;;  %v641_v26 = vpop.f32.mrb[1].mxu0 }
 0x150   :  { %v196_v27 = vpop.f32.mrb[2].mxu0 }
 0x151   :  { %v642_v28 = vpop.f32.mrb[3].mxu0  ;;  %660 = vmatmul.mubr.bf16.vlgmr.msra.gmra.mrb[0].mxu1 %v199_v25 }
 0x152   :  { %699 = vmatprep.mubr.msk.bf16.mxu1 %vm897_vm0, %v896_v0  ;;  %684 = vmatpush3.bf16.msra.mxu1 %v737_v39 }
 0x153   :  { %685 = vmatprep.subr.bf16.mxu1 %v896_v0 }
 0x156   :  { %686 = vmatpush3.bf16.msra.mxu1 %v738_v40 }
 0x157   :  { %687 = vmatprep.subr.bf16.mxu1 %v896_v0 }
 0x15a   :  { %688 = vmatpush3.bf16.msra.mxu1 %v739_v41 }
 0x15b   :  { %689 = vmatprep.subr.bf16.mxu1 %v896_v0 }
 0x15e   :  { %690 = vmatpush3.bf16.msra.mxu1 %v740_v42 }
 0x15f   :  { %691 = vmatprep.subr.bf16.mxu1 %v896_v0 }
 0x162   :  { %692 = vmatpush3.bf16.msra.mxu1 %v741_v43 }
 0x163   :  { %693 = vmatprep.subr.bf16.mxu1 %v896_v0 }
 0x166   :  { %694 = vmatpush3.bf16.msra.mxu1 %v742_v44 }
 0x167   :  { %695 = vmatprep.subr.bf16.mxu1 %v896_v0 }
 0x16a   :  { %696 = vmatpush3.bf16.msra.mxu1 %v743_v45 }
 0x16b   :  { %697 = vmatprep.subr.bf16.mxu1 %v896_v0 }
 0x16e   :  { %698 = vmatpush3.bf16.msra.mxu1 %v744_v46 }
 0x224   :  { %v305_v32 = vpop.f32.mrb[0].mxu1 }
 0x225   :  { %v306_v33 = vadd.f32 %v561_v31, %v305_v32  ;;  %v661_v34 = vpop.f32.mrb[1].mxu1 }
 0x226   :  { %v308_v35 = vpop.f32.mrb[2].mxu1 }
 0x227   :  { %v311_v36 = vmax.f32 %v306_v33, 0.0  ;;  %v662_v37 = vpop.f32.mrb[3].mxu1 }
 0x229   :  { %v312_v38 = vpack.c.bf16 %v311_v36, %v311_v36 }
 0x22b   :  { %680 = vmatmul.mubr.bf16.vlgmr.msra.gmra.mrb[4].mxu0 %v312_v38 }
 0x2fe   :  { %v418_v48 = vpop.f32.mrb[4].mxu0 }
 0x2ff   :  { %v419_v49 = vadd.f32 %v570_v47, %v418_v48  ;;  %v681_v50 = vpop.f32.mrb[5].mxu0 }
 0x300   :  { %v421_v51 = vpop.f32.mrb[6].mxu0 }
 0x301   :  { %v424_v52 = vsub.f32 0.0, %v419_v49  ;;  %v682_v53 = vpop.f32.mrb[7].mxu0 }
 0x303   :  { %v425_v54 = vmul.f32 1.442695, %v424_v52 }
 0x305   :  { %745 = vpow2.f32 %v425_v54 }
 0x30f   :  { %v746_v55 = vpop.eup %745 }
 0x310   :  { %v427_v56 = vadd.f32 1.0, %v746_v55 }
 0x312   :  { %747 = vrcp.f32 %v427_v56 }
 0x31c   :  { %v748_v57 = vpop.eup %747 }
 0x31d   :  { %v429_v58 = vmul.f32 %v748_v57, %v193_v24 }
 0x31f   :  { %v430_v59 = vpack.c.bf16 %v429_v58, %v429_v58 }
 0x321   :  { %700 = vmatmul.mubr.bf16.vlgmr.msra.gmra.mrb[4].mxu1 %v430_v59 }
 0x3f4   :  { %v529_v60 = vpop.f32.mrb[4].mxu1 }
 0x3f5   :  { %535 = vst [vmem:[#allocation11] sm:$0xff] %v529_v60  ;;  %v701_v61 = vpop.f32.mrb[5].mxu1 }
 0x3f6   :  { %v532_v62 = vpop.f32.mrb[6].mxu1 }
 0x3f7   :  { %870 = shalt.err (!%p867_p2)
}
 0x3f8   :  { %s871_s20 = scalar_lea.hbm %s1076_s7, 128 }
 0x3f9   :  { %p872_p3 = scmp.ne.s32.totalorder %s1076_s7, %s871_s20  ;;  %p875_p4 = scmp.lt.u32.totalorder %s871_s20, %s1076_s7 }
 0x3fb   :  { %p877_p5 = pnand %p875_p4, %p872_p3 }
 0x3fd   :  { %880 = shalt.err (!%p877_p5)
}
 0x3fe   :  { %545 = dma.vmem_to_hbm [thread:$0]  %s543_s16, 128, %s1076_s7, [#allocation4]   ;;  %v702_v63 = vpop.f32.mrb[7].mxu1 }
 0x3ff   :  { %887 = dma.done.wait [#allocation4], 128  }
 0x400   :  { %888 = vsyncadd [#allocation4], 4294967168 }
 0x401   :  { %549 = vsyncpa [#allocation3], 1 }
 0x402   :  { %550 = vsyncpa [#allocation6], 1 }
 0x403   :  { %551 = vsyncpa [#allocation9], 1 }
 0x404   :  { %552 = vsyncpa [#allocation4], 1 }

</bundles_post_ra>
